<compile_context>
chip_gen: v5e
topology: v5e:2x2
jax: 0.10.0
libtpu: 0.0.40
codegen_flags: <defaults>
</compile_context>

<pallas_src>
import jax
import jax.numpy as jnp
from jax.experimental import pallas as pl
from jax.experimental.pallas import tpu as pltpu

IN_DIM = 50
HID_DIM = 50
OUT_DIM = 10


def _round_up(a, m):
    return (a + m - 1) // m * m


def _multilenet_o_kernel(x_ref, w1_ref, b1_ref, w2_ref, b2_ref, out_ref):
    # x_ref: (tb, 50) f32, w refs bf16, biases f32, out_ref: (tb, 10) f32.
    x = x_ref[...].astype(w1_ref.dtype)  # in-kernel f32 -> bf16 (no wrapper pass)

    # fc1 + ReLU (f32 accumulation on the MXU, bias/ReLU in f32 on the VPU).
    h = jnp.dot(x, w1_ref[...], preferred_element_type=jnp.float32) + b1_ref[...]
    h = jnp.maximum(h, 0.0)

    # Dropout: nn.Dropout(p=0.5) is identity in eval mode; implemented as such.
    # TODO(synk): training-mode dropout would need pltpu.prng_seed/prng_random_bits
    #             plus 1/(1-p) scaling.

    # fc2 (cast activations to the weight dtype for the MXU, accumulate in f32).
    z = jnp.dot(h.astype(w2_ref.dtype), w2_ref[...],
                preferred_element_type=jnp.float32) + b2_ref[...]

    # Numerically stable log-softmax over the 10 real classes.
    m = jnp.max(z, axis=1, keepdims=True)
    shifted = z - m
    lse = jnp.log(jnp.sum(jnp.exp(shifted), axis=1, keepdims=True))
    out_ref[...] = (shifted - lse).astype(out_ref.dtype)


def multilenet_o_forward(x, mask, params, *, tile_b=2048,
                         compute_dtype=jnp.bfloat16):
    """x: (B, 50) float32, mask: passthrough. Returns (log_probs (B, 10), mask)."""
    w1, b1, w2, b2 = params
    B = x.shape[0]

    # Batch tile: big enough to amortize per-step overhead, but capped so the
    # grid has >=2 steps when possible (v7x: 2 TensorCores share the
    # "parallel" axis).  Always a multiple of 8 for sublane alignment.
    half = (B + 1) // 2
    tb = min(tile_b, _round_up(half, 8))
    grid = (pl.cdiv(B, tb),)

    # Tiny weights: one-time bf16 cast; resident in VMEM across the grid.
    w1c = w1.astype(compute_dtype)
    w2c = w2.astype(compute_dtype)
    b1c = b1.reshape(1, HID_DIM).astype(jnp.float32)
    b2c = b2.reshape(1, OUT_DIM).astype(jnp.float32)

    out = pl.pallas_call(
        _multilenet_o_kernel,
        out_shape=jax.ShapeDtypeStruct((B, OUT_DIM), jnp.float32),
        grid_spec=pltpu.PrefetchScalarGridSpec(
            num_scalar_prefetch=0,
            grid=grid,
            in_specs=[
                pl.BlockSpec((tb, IN_DIM), lambda i: (i, 0)),         # x: tiled batch
                pl.BlockSpec((IN_DIM, HID_DIM), lambda i: (0, 0)),    # w1: resident
                pl.BlockSpec((1, HID_DIM), lambda i: (0, 0)),         # b1: resident
                pl.BlockSpec((HID_DIM, OUT_DIM), lambda i: (0, 0)),   # w2: resident
                pl.BlockSpec((1, OUT_DIM), lambda i: (0, 0)),         # b2: resident
            ],
            out_specs=pl.BlockSpec((tb, OUT_DIM), lambda i: (i, 0)),
        ),
        compiler_params=pltpu.CompilerParams(
            dimension_semantics=("parallel",),
        ),
    )(x, w1c, b1c, w2c, b2c)

    return out, mask


def init_params(key):
    """Deterministic init mimicking PyTorch Linear default (U[-1/sqrt(fan_in), +])."""
    k1, k2, k3, k4 = jax.random.split(key, 4)
    bound1 = 1.0 / jnp.sqrt(jnp.float32(IN_DIM))
    bound2 = 1.0 / jnp.sqrt(jnp.float32(HID_DIM))
    # Stored as (in_features, out_features) — transposed vs. PyTorch's (out, in).
    w1 = jax.random.uniform(k1, (IN_DIM, HID_DIM), jnp.float32, -bound1, bound1)
    b1 = jax.random.uniform(k2, (1, HID_DIM), jnp.float32, -bound1, bound1)
    w2 = jax.random.uniform(k3, (HID_DIM, OUT_DIM), jnp.float32, -bound2, bound2)
    b2 = jax.random.uniform(k4, (1, OUT_DIM), jnp.float32, -bound2, bound2)
    return w1, b1, w2, b2


def _reference_forward(x, mask, params, compute_dtype=jnp.bfloat16):
    """Pure-JAX reference mirroring the kernel's cast/accumulation pattern."""
    w1, b1, w2, b2 = params
    xc = x.astype(compute_dtype)
    h = jnp.maximum(
        jnp.dot(xc, w1.astype(compute_dtype),
                preferred_element_type=jnp.float32) + b1.reshape(1, -1), 0.0)
    z = jnp.dot(h.astype(compute_dtype), w2.astype(compute_dtype),
                preferred_element_type=jnp.float32) + b2.reshape(1, -1)
    return jax.nn.log_softmax(z, axis=1), mask


if __name__ == "__main__":
    key = jax.random.PRNGKey(0)
    k_params, k_x = jax.random.split(key)

    params = init_params(k_params)
    B = 20  # deliberately not a multiple of the tile to exercise ragged blocks
    x = jax.random.normal(k_x, (B, IN_DIM), jnp.float32)
    mask = jnp.ones((B, HID_DIM), jnp.float32)  # passthrough, like the PyTorch forward

    # Small tile (8) so the demo runs a multi-step grid with a ragged last
    # block; production default is tile_b=2048.
    log_probs, mask_out = multilenet_o_forward(x, mask, params, tile_b=8)
    log_probs = jax.block_until_ready(log_probs)

    ref_log_probs, _ = _reference_forward(x, mask, params)
    assert log_probs.shape == (B, OUT_DIM)
    assert jnp.allclose(log_probs, ref_log_probs, atol=1e-3, rtol=1e-3)
    # Rows should be valid log-probabilities (sum of exp == 1).
    assert jnp.allclose(jnp.sum(jnp.exp(log_probs), axis=1), 1.0, atol=1e-3)
    assert mask_out is mask

    print("KERNEL_OK")
</pallas_src>

<mosaic_0001>
module attributes {stable_mosaic.version = 11 : i64} {
  func.func @_multilenet_o_kernel(%arg0: i32, %arg1: memref<8x50xf32, #tpu.memory_space<vmem>>, %arg2: memref<50x50xbf16, #tpu.memory_space<vmem>>, %arg3: memref<1x50xf32, #tpu.memory_space<vmem>>, %arg4: memref<50x10xbf16, #tpu.memory_space<vmem>>, %arg5: memref<1x10xf32, #tpu.memory_space<vmem>>, %arg6: memref<8x10xf32, #tpu.memory_space<vmem>>) attributes {dimension_semantics = [#tpu.dimension_semantics<parallel>], iteration_bounds = array<i64: 3>, scalar_prefetch = 0 : i64, scratch_operands = 0 : i64, tpu.core_type = #tpu.core_type<tc>, window_params = [{transform_indices = @transform_0, window_bounds = array<i64: 8, 50>}, {pipeline_mode = #tpu.pipeline_mode<synchronous>, transform_indices = @transform_1, window_bounds = array<i64: 50, 50>}, {pipeline_mode = #tpu.pipeline_mode<synchronous>, transform_indices = @transform_2, window_bounds = array<i64: 1, 50>}, {pipeline_mode = #tpu.pipeline_mode<synchronous>, transform_indices = @transform_3, window_bounds = array<i64: 50, 10>}, {pipeline_mode = #tpu.pipeline_mode<synchronous>, transform_indices = @transform_4, window_bounds = array<i64: 1, 10>}, {transform_indices = @transform_5, window_bounds = array<i64: 8, 10>}]} {
    %c0 = arith.constant 0 : index
    %c0_0 = arith.constant 0 : index
    %0 = vector.load %arg1[%c0, %c0_0] : memref<8x50xf32, #tpu.memory_space<vmem>>, vector<8x50xf32>
    %1 = arith.truncf %0 : vector<8x50xf32> to vector<8x50xbf16>
    %c0_1 = arith.constant 0 : index
    %c0_2 = arith.constant 0 : index
    %2 = vector.load %arg2[%c0_1, %c0_2] : memref<50x50xbf16, #tpu.memory_space<vmem>>, vector<50x50xbf16>
    %cst = arith.constant dense<0.000000e+00> : vector<8x50xf32>
    %3 = tpu.matmul %1, %2, %cst {dimension_numbers = #tpu.dot_dimension_numbers<[1], [0], [0], [1], [0, 0, 1, 1], [], []>} : vector<8x50xbf16>, vector<50x50xbf16>, vector<8x50xf32> -> vector<8x50xf32>
    %c0_3 = arith.constant 0 : index
    %c0_4 = arith.constant 0 : index
    %4 = vector.load %arg3[%c0_3, %c0_4] : memref<1x50xf32, #tpu.memory_space<vmem>>, vector<1x50xf32>
    %5 = vector.broadcast %4 : vector<1x50xf32> to vector<8x50xf32>
    %6 = arith.addf %3, %5 : vector<8x50xf32>
    %cst_5 = arith.constant 0.000000e+00 : f32
    %7 = vector.broadcast %cst_5 : f32 to vector<8x50xf32>
    %8 = arith.maximumf %6, %7 : vector<8x50xf32>
    %9 = arith.truncf %8 : vector<8x50xf32> to vector<8x50xbf16>
    %c0_6 = arith.constant 0 : index
    %c0_7 = arith.constant 0 : index
    %10 = vector.load %arg4[%c0_6, %c0_7] : memref<50x10xbf16, #tpu.memory_space<vmem>>, vector<50x10xbf16>
    %cst_8 = arith.constant dense<0.000000e+00> : vector<8x10xf32>
    %11 = tpu.matmul %9, %10, %cst_8 {dimension_numbers = #tpu.dot_dimension_numbers<[1], [0], [0], [1], [0, 0, 1, 1], [], []>} : vector<8x50xbf16>, vector<50x10xbf16>, vector<8x10xf32> -> vector<8x10xf32>
    %c0_9 = arith.constant 0 : index
    %c0_10 = arith.constant 0 : index
    %12 = vector.load %arg5[%c0_9, %c0_10] : memref<1x10xf32, #tpu.memory_space<vmem>>, vector<1x10xf32>
    %13 = vector.broadcast %12 : vector<1x10xf32> to vector<8x10xf32>
    %14 = arith.addf %11, %13 : vector<8x10xf32>
    %cst_11 = arith.constant dense<0xFF800000> : vector<8xf32>
    %15 = vector.multi_reduction <maximumf>, %14, %cst_11 [1] : vector<8x10xf32> to vector<8xf32>
    %16 = vector.shape_cast %15 : vector<8xf32> to vector<8x1xf32>
    %17 = vector.broadcast %16 : vector<8x1xf32> to vector<8x10xf32>
    %18 = arith.subf %14, %17 : vector<8x10xf32>
    %19 = math.exp %18 : vector<8x10xf32>
    %cst_12 = arith.constant dense<0.000000e+00> : vector<8xf32>
    %20 = vector.multi_reduction <add>, %19, %cst_12 [1] : vector<8x10xf32> to vector<8xf32>
    %21 = vector.shape_cast %20 : vector<8xf32> to vector<8x1xf32>
    %22 = math.log %21 : vector<8x1xf32>
    %23 = vector.broadcast %22 : vector<8x1xf32> to vector<8x10xf32>
    %24 = arith.subf %18, %23 : vector<8x10xf32>
    %c0_13 = arith.constant 0 : index
    %c0_14 = arith.constant 0 : index
    %25 = vector.load %arg6[%c0_13, %c0_14] : memref<8x10xf32, #tpu.memory_space<vmem>>, vector<8x10xf32>
    tpu.vector_store %arg6[%c0_13, %c0_14], %24 {strides = array<i32>} : memref<8x10xf32, #tpu.memory_space<vmem>>, vector<8x10xf32>,
    return
  }
  func.func @transform_0(%arg0: i32) -> (i32, i32) {
    %c0_i32 = arith.constant 0 : i32
    %c0_i32_0 = arith.constant 0 : i32
    return %arg0, %c0_i32 : i32, i32
  }
  func.func @transform_1(%arg0: i32) -> (i32, i32) {
    %c0_i32 = arith.constant 0 : i32
    %c0_i32_0 = arith.constant 0 : i32
    %c0_i32_1 = arith.constant 0 : i32
    return %c0_i32, %c0_i32_0 : i32, i32
  }
  func.func @transform_2(%arg0: i32) -> (i32, i32) {
    %c0_i32 = arith.constant 0 : i32
    %c0_i32_0 = arith.constant 0 : i32
    %c0_i32_1 = arith.constant 0 : i32
    return %c0_i32, %c0_i32_0 : i32, i32
  }
  func.func @transform_3(%arg0: i32) -> (i32, i32) {
    %c0_i32 = arith.constant 0 : i32
    %c0_i32_0 = arith.constant 0 : i32
    %c0_i32_1 = arith.constant 0 : i32
    return %c0_i32, %c0_i32_0 : i32, i32
  }
  func.func @transform_4(%arg0: i32) -> (i32, i32) {
    %c0_i32 = arith.constant 0 : i32
    %c0_i32_0 = arith.constant 0 : i32
    %c0_i32_1 = arith.constant 0 : i32
    return %c0_i32, %c0_i32_0 : i32, i32
  }
  func.func @transform_5(%arg0: i32) -> (i32, i32) {
    %c0_i32 = arith.constant 0 : i32
    %c0_i32_0 = arith.constant 0 : i32
    return %arg0, %c0_i32 : i32, i32
  }
}

</mosaic_0001>

<bundles_post_ra>
// kernel: tpu_custom_call.1
= control target key start
LH: loop header
LB: loop body
LE: loop exit
PB: predicated region body
PF: predicated region fallthrough
CT: control target
= control target key end

     0   :  { %10 = vsyncpa [#allocation3], 0  ;;  %s740_s0 = inlined_call_operand.hbm [shape: f32[20,50], index: 0, kind: input, shape index: {}]   ;;  %s741_s1 = inlined_call_operand.vmem [shape: bf16[50,50], index: 1, kind: input, shape index: {}]   ;;  %s742_s2 = inlined_call_operand.vmem [shape: f32[1,50], index: 2, kind: input, shape index: {}]   ;;  %s743_s3 = inlined_call_operand.vmem [shape: bf16[50,10], index: 3, kind: input, shape index: {}]   ;;  %s744_s4 = inlined_call_operand.vmem [shape: f32[1,10], index: 4, kind: input, shape index: {}]   ;;  %s745_s5 = inlined_call_operand.vmem [shape: f32[20,10], index: 5, kind: output, shape index: {}]  }
   0x1   :  { %12 = vsyncpa [#allocation3 + $0x1], 0  ;;  %s613_s18 = smov 0   ;;  %s615_s19 = smov 0  }
   0x2   :  { %s617_s20 = smov 0   ;;  %s619_s21 = smov 0  }
   0x3 LB: > { %s632_s22 = sadd.s32 4294967295, %s581_s21   ;;  %s635_s23 = sadd.s32 1, %s581_s21   ;;  %s581_s21 = sphi %s619_s21, %s752_s21   ;;  %s577_s20 = sphi %s617_s20, %s751_s20   ;;  %s573_s19 = sphi %s615_s19, %s750_s19   ;;  %s569_s18 = sphi %s613_s18, %s749_s18  }
   0x4   : > { %s22_s24 = ssub.s32 %s581_s21, %s635_s23  ;;  %s25_s25 = sadd.s32 1, %s577_s20 }
   0x5   : > { %p23_p0 = scmp.eq.s32.totalorder %s22_s24, 0  ;;  %p32_p1 = scmp.ne.s32.totalorder %s577_s20, %s573_s19 }
   0x6   : > { %p33_p2 = scmp.eq.s32.totalorder %s581_s21, 0  ;;  %p38_p3 = scmp.ne.s32.totalorder %s573_s19, %s569_s18 }
   0x7   : > { %s645_s26 = scalar_select %p23_p0, %s577_s20, %s25_s25  }
   0x8   : > { %p647_p4 = por %p33_p2, %p32_p1  ;;  %p39_p5 = scmp.eq.s32.totalorder %s632_s22, 0 }
   0x9   : > { %p478_p6 = scmp.lt.s32.totalorder %s581_s21, 3  ;;  %s184_s29 = sand.u32 1, %s577_s20  }
   0xa   : > { %p653_p7 = por %p39_p5, %p38_p3  ;;  %s433_s30 = sshll.u32 %s184_s29, 3 }
   0xb   : > { %s434_s6 = sshll.u32 %s581_s21, 3  ;;  %s188_s10 = scalar_lea.vmem [#allocation2], %s433_s30 }
   0xc   : > { %s192_s9 = scalar_lea.hbm %s740_s0, %s434_s6  ;;  %s196_s11 = sshll.u32 %s188_s10, 4  ;;  %s197_s11 = int_to_ptr.vmem [resolvable:$true] %s196_s11 }
   0xd   : > { %s194_s12 = sshll.u32 %s192_s9, 4  ;;  %p664_p8 = pnand %p478_p6, %p647_p4  ;;  %s195_s12 = int_to_ptr.hbm [resolvable:$true] %s194_s12 }
   0xe   : > { %p435_p9 = scmp.ge.s32.totalorder %s581_s21, 1  ;;  %p201_p10 = scmp.lt.s32.totalorder %s581_s21, 4 }
   0xf   : > { %s185_s14 = scalar_lea.sflag [#allocation3], %s184_s29  ;;  %s517_s15 = sshra.s32 %s195_s12, 4  ;;  %s518_s15 = int_to_ptr.hbm [resolvable:$true] %s517_s15 }
  0x10   : > { %s519_s16 = scalar_lea.hbm %s518_s15, 8  ;;  %p521_p12 = pneg %p664_p8 }
  0x11   : > { %p520_p11 = scmp.ne.s32.totalorder %s518_s15, %s519_s16  ;;  %s524_s24 = scalar_lea.hbm %s740_s0, 24 }
  0x12   : > { %p525_p1 = scmp.lt.s32.totalorder %s518_s15, %s740_s0  ;;  %p526_p2 = scmp.lt.s32.totalorder %s524_s24, %s519_s16 }
  0x13   : > { %p522_p13 = pnand %p521_p12, %p520_p11 }
  0x14   : > { %p527_p3 = por %p526_p2, %p525_p1 }
  0x15   : > { %p523_p0 = pneg %p522_p13 }
  0x17   : > { %p528_p4 = pnand %p527_p3, %p523_p0 }
  0x19   : > { %531 = shalt.err (!%p528_p4)
}
  0x1a   : > { %477 = dma.hbm_to_vmem [thread:$0]  (!%p664_p8), %s195_s12, 128, %s197_s11, %s185_s14  }
  0x1b   : > { %p202_p5 = pnand %p435_p9, %p201_p10 }
  0x1c   : > { %s207_s29 = sand.u32 (!%p202_p5), 1, %s573_s19  }
  0x1d   : > { %205 = sbr.rel (%p202_p5) target bundleno = 573 (0x23d), region = 40  ;;  %s436_s30 = sshll.u32 (!%p202_p5), %s207_s29, 3 }
  0x1e   : > { %s208_s6 = scalar_lea.sflag (!%p202_p5), [#allocation3], %s207_s29  ;;  %s211_s7 = scalar_lea.vmem (!%p202_p5), [#allocation2], %s436_s30 }
  0x22   : > { %564 = dma.done.wait (%p653_p7), %s208_s6, 128  }
  0x23   : > { %566 = vsyncadd (%p653_p7), %s208_s6, 4294967168  ;;  %v251_v0 = vld [vmem:[%s741_s1 + $0x18] sm:$0x1]  ;;  %vm281_vm0 = vcmask 1040384   ;;  %v468_v7 = vld [vmem:[%s741_s1 + $0x10] sm:$0xff]  ;;  %vm277_vm1 = vcmask 408576  }
  0x24   : > { %v269_v1 = vunpack.c.l.b16 %v251_v0  ;;  %v306_v2 = vld [vmem:[%s743_s3 + $0x18] sm:$0x1]  ;;  %v471_v9 = vld [vmem:[%s743_s3 + $0x10] sm:$0xff]  ;;  %v467_v10 = vld [vmem:[%s741_s1 + $0x8] sm:$0xff]  ;;  %vm351_vm2 = vcmask 80896   ;;  %p238_p6 = scmp.lt.s32.totalorder %s632_s22, 2 }
  0x25   : > { %v324_v3 = vunpack.c.l.b16 %v306_v2  ;;  %v466_v11 = vld [vmem:[%s741_s1] sm:$0xff]  ;;  %v470_v14 = vld [vmem:[%s743_s3 + $0x8] sm:$0xff] }
  0x26   : > { %v273_v4 = vpack.c.b16 %v269_v1, %v269_v1  ;;  %v243_v12 = vld [vmem:[%s211_s7] sm:$0xff]  ;;  %s754_s22 = smov (!%p238_p6, %s632_s22), 2 }
  0x27   : > { %v328_v5 = vpack.c.b16 %v324_v3, %v324_v3  ;;  %v244_v13 = vpack.c.bf16 %v243_v12, %v243_v12  ;;  %v469_v15 = vld [vmem:[%s743_s3] sm:$0xff]  ;;  %s437_s8 = sshll.u32 %s754_s22, 3 }
  0x28   : > { %v283_v6 = vsel %vm281_vm0, %v273_v4, 0  ;;  %v511_v16 = vld [vmem:[%s742_s2] ss:$0 sm:$0xff]  ;;  %s241_s21 = scalar_lea.vmem %s745_s5, %s437_s8 }
  0x29   : > { %289 = vmatpush.bf16.msra.mxu0 %v283_v6  ;;  %v336_v8 = vsel %vm281_vm0, %v328_v5, 0  ;;  %v512_v22 = vld [vmem:[%s744_s4] ss:$0 sm:$0xff] }
  0x2a   : > { %342 = vmatpush.bf16.msra.mxu1 %v336_v8 }
  0x2d   : > { %290 = vmatpush.bf16.msra.mxu0 %v468_v7 }
  0x2e   : > { %343 = vmatpush.bf16.msra.mxu1 %v471_v9 }
  0x31   : > { %291 = vmatpush.bf16.msra.mxu0 %v467_v10 }
  0x32   : > { %344 = vmatpush.bf16.msra.mxu1 %v470_v14 }
  0x35   : > { %292 = vmatpush.bf16.msra.mxu0 %v466_v11 }
  0x36   : > { %345 = vmatpush.bf16.msra.mxu1 %v469_v15 }
  0x38   : > { %450 = vmatmul.msk.bf16.vlgmr.msra.gmra.mxu0 %vm277_vm1, %v244_v13 }
  0xb5   : > { %v294_v17 = vpop.f32.mrf.mxu0 }
  0xb6   : > { %v295_v18 = vadd.f32 %v511_v16, %v294_v17 }
  0xb8   : > { %v298_v19 = vmax.f32 %v295_v18, 0.0 }
  0xba   : > { %v299_v20 = vpack.c.bf16 %v298_v19, %v298_v19 }
  0xbc   : > { %463 = vmatmul.msk.bf16.vlgmr.msra.gmra.mxu1 %vm277_vm1, %v299_v20 }
  0xbd   : > { %v296_v21 = vpop.f32.mrf.mxu0 }
 0x139   : > { %v347_v23 = vpop.f32.mrf.mxu1 }
 0x13a   : > { %v348_v24 = vadd.f32 %v512_v22, %v347_v23 }
 0x13c   : > { %v352_v25 = vsel %vm351_vm2, %v348_v24, -inf }
 0x13d   : > { %353 = vmax.xlane.f32.xlu0 %v352_v25 }
 0x141   : > { %v349_v26 = vpop.f32.mrf.mxu1 }
 0x1b0   : > { %v354_v27 = vpop.xlane.xlu0 %353 }
 0x1b1   : > { %v355_v28 = vsub.f32 %v348_v24, %v354_v27 }
 0x1b3   : > { %v356_v29 = vmul.f32 1.442695, %v355_v28 }
 0x1b5   : > { %513 = vpow2.f32 %v356_v29 }
 0x1bb   : > { %v514_v30 = vpop.eup %513 }
 0x1bc   : > { %v358_v31 = vsel %vm351_vm2, %v514_v30, 0.0 }
 0x1bd   : > { %359 = vadd.xlane.f32.xlu0 %v358_v31 }
 0x230   : > { %v360_v32 = vpop.xlane.xlu0 %359 }
 0x231   : > { %515 = vlog2.f32 %v360_v32 }
 0x237   : > { %v516_v33 = vpop.eup %515 }
 0x238   : > { %v362_v34 = vmul.f32 0.6931472, %v516_v33 }
 0x23a   : > { %v363_v35 = vsub.f32 %v355_v28, %v362_v34 }
 0x23c   : > { %364 = vst.msk [vmem:[%s241_s21] sm:$0xff] %vm351_vm2, %v363_v35 }
 0x23d PF: > { %p15_p7 = scmp.ge.s32.totalorder %s635_s23, 5   ;;  %s749_s18 = smov %s573_s19 }
 0x23e   : > { %s750_s19 = smov %s577_s20  ;;  %s751_s20 = smov %s645_s26 }
 0x23f   : > { %s752_s21 = smov %s635_s23  ;;  %17 = sbr.rel (!%p15_p7) target bundleno = 3 (0x3), region = 80 }
 0x244   :  { %384 = vsyncpa [#allocation3], 1 }
 0x245   :  { %386 = vsyncpa [#allocation3 + $0x1], 1 }

</bundles_post_ra>
